<compile_context>
chip_gen: v7x
topology: tpu7x:2x2x1
jax: 0.10.0
libtpu: 0.0.40
codegen_flags: <defaults>
</compile_context>

<pallas_src>
import math

import jax
import jax.numpy as jnp
from jax.experimental import pallas as pl
from jax.experimental.pallas import tpu as pltpu


def _round_up(x, m):
    return ((x + m - 1) // m) * m


def _san_kernel(
    emb_ref,      # (TB, S, E)  bf16 raw sentence embeddings
    mask_ref,     # (TB, S)     f32, 1.0 == padded sentence (masked out)
    feat_ref,     # (TB, F)     f32 structured features
    normed_ref,   # (1, E)      f32 normalized trainable vector
    wk_ref,       # (H, E)      bf16 key_layer.weight (not transposed)
    wvt_ref,      # (E, H)      bf16 value_layer.weight^T
    wm_t_ref,     # (F, H)      f32 linear_map.weight^T
    bm_ref,       # (1, H)      f32 linear_map.bias
    bv_ref,       # (1, H)      f32 value_layer.bias
    wcd_ref,      # (H, LP)     f32 classifier weights (doc half), lane-padded
    wcf_ref,      # (H, LP)     f32 classifier weights (fmap half), lane-padded
    bc_ref,       # (1, LP)     f32 classifier bias, lane-padded
    logits_ref,   # (TB, LP)    output logits (real values in [:, :2])
    attn_ref,     # (TB, S1P)   output attention weights (real in [:, :S+1])
):
    f32 = jnp.float32
    bf16 = jnp.bfloat16

    emb = emb_ref[...].astype(f32)        # upcast once; elementwise math in f32
    mask = mask_ref[...]
    feat = feat_ref[...]
    TB, S, E = emb.shape
    H = bm_ref.shape[-1]
    S1P = attn_ref.shape[-1]
    scale = 1.0 / math.sqrt(H)

    # query: feature_map = linear_map(features)                        (TB, H)
    fmap = jnp.dot(feat, wm_t_ref[...], preferred_element_type=f32) + bm_ref[...]

    # fold the query into the key weights: qk[b] = fmap[b] @ Wk        (TB, E)
    # (the key bias adds a per-example constant to every score and cancels
    #  under softmax; the same shift is dropped from the trainable slot too)
    qk = jnp.dot(fmap.astype(bf16), wk_ref[...], preferred_element_type=f32)

    # attention scores against raw embeddings (VPU mul + XLU reduce)   (TB, S)
    scores = jnp.sum(emb * qk[:, None, :], axis=-1) * scale
    # masked_fill with a large finite negative (== -inf after softmax, NaN-proof)
    scores = jnp.where(mask != 0.0, jnp.float32(-1e30), scores)
    # trainable slot's score (never masked)                            (TB, 1)
    score0 = jnp.sum(qk * normed_ref[...], axis=-1, keepdims=True) * scale

    # softmax with the trainable slot as a separate column sharing max/denominator
    m = jnp.maximum(score0, jnp.max(scores, axis=-1, keepdims=True))
    p0 = jnp.exp(score0 - m)
    ps = jnp.exp(scores - m)                     # masked columns underflow to 0
    inv = 1.0 / (p0 + jnp.sum(ps, axis=-1, keepdims=True))
    attn0 = p0 * inv                             # (TB, 1)
    attn_s = ps * inv                            # (TB, S)

    # deferred value projection: doc = (sum_slots attn*emb) @ Wv^T + bv
    combined = jnp.sum(emb * attn_s[:, :, None], axis=1)               # (TB, E)
    combined = combined + attn0 * normed_ref[...]
    doc = jnp.dot(combined.astype(bf16), wvt_ref[...],
                  preferred_element_type=f32) + bv_ref[...]            # (TB, H)

    # classifier split per half (no concat); lane-padded weights give a
    # lane-dense (TB, LP) logits store for free.
    logits = (jnp.dot(doc, wcd_ref[...], preferred_element_type=f32)
              + jnp.dot(fmap, wcf_ref[...], preferred_element_type=f32)
              + bc_ref[...])                                           # (TB, LP)

    logits_ref[...] = logits

    pieces = [attn0, attn_s]
    if S1P > S + 1:
        pieces.append(jnp.zeros((TB, S1P - S - 1), f32))
    attn_ref[...] = jnp.concatenate(pieces, axis=-1)                   # (TB, S1P)


def _choose_batch_tile(B, S, E, batch_tile):
    """Batch tile: multiple of 8, VMEM-budgeted, >=2 grid steps when possible."""
    b8 = _round_up(max(B, 1), 8)
    per_row_bytes = S * E * 2                      # bf16 embeddings row
    budget = 8 << 20                               # per-buffer budget (double-buffered)
    tb_mem = max(8, (budget // max(per_row_bytes, 1)) // 8 * 8)
    tb = min(_round_up(batch_tile, 8), tb_mem, b8)
    if b8 >= 16:  # keep >= 2 grid steps so both v7x TensorCores get work
        tb = min(tb, _round_up(pl.cdiv(b8, 2), 8))
    return max(8, tb)


def sentence_attention_forward(params, embeddings, masks, features,
                               *, batch_tile=256):
    """Pallas forward pass.

    embeddings: (B, S, E) float32
    masks:      (B, S)    float32, 1.0 == padded sentence
    features:   (B, F)    float32
    returns (logits (B, 2), attn_weight (B, S+1))
    """
    B, S, E = embeddings.shape
    F = features.shape[-1]
    H = params["wm"].shape[0]
    S1 = S + 1
    LP = 128                       # lane-dense logits slab width
    S1P = _round_up(S1, 128)       # lane-dense attention slab width

    f32 = jnp.float32
    bf16 = jnp.bfloat16

    # ---- tiny constant weight prep (pure JAX) ----
    wm_t = params["wm"].T.astype(f32)                         # (F, H)
    bm = params["bm"].reshape(1, H).astype(f32)
    wk = params["wk"].astype(bf16)                            # (H, E)
    wv_t = params["wv"].T.astype(bf16)                        # (E, H)
    bv = params["bv"].reshape(1, H).astype(f32)

    trainable = params["trainable"].astype(f32)               # (1, E)
    normed = (trainable / jnp.linalg.norm(trainable)).reshape(1, E)

    wc = params["wc"].astype(f32)                             # (2, 2H)
    wc_doc = jnp.pad(wc[:, :H].T, ((0, 0), (0, LP - 2)))      # (H, LP)
    wc_fmap = jnp.pad(wc[:, H:].T, ((0, 0), (0, LP - 2)))     # (H, LP)
    bc = jnp.pad(params["bc"].astype(f32).reshape(1, 2),
                 ((0, 0), (0, LP - 2)))                       # (1, LP)

    # ---- batch tiling ----
    TB = _choose_batch_tile(B, S, E, batch_tile)
    B_pad = _round_up(B, TB)
    pad = B_pad - B
    if pad:
        embeddings = jnp.pad(embeddings, ((0, pad), (0, 0), (0, 0)))
        masks = jnp.pad(masks, ((0, pad), (0, 0)))
        features = jnp.pad(features, ((0, pad), (0, 0)))
    emb_bf16 = embeddings.astype(bf16)        # halves the dominant DMA stream
    masks = masks.astype(f32)
    features = features.astype(f32)

    const = lambda b: (0, 0)

    grid_spec = pltpu.PrefetchScalarGridSpec(
        num_scalar_prefetch=0,
        grid=(B_pad // TB,),
        in_specs=[
            pl.BlockSpec((TB, S, E), lambda b: (b, 0, 0)),   # embeddings (bf16)
            pl.BlockSpec((TB, S), lambda b: (b, 0)),         # masks
            pl.BlockSpec((TB, F), lambda b: (b, 0)),         # features
            pl.BlockSpec((1, E), const),                     # normed trainable
            pl.BlockSpec((H, E), const),                     # Wk (bf16)
            pl.BlockSpec((E, H), const),                     # Wv^T (bf16)
            pl.BlockSpec((F, H), const),                     # Wm^T
            pl.BlockSpec((1, H), const),                     # bm
            pl.BlockSpec((1, H), const),                     # bv
            pl.BlockSpec((H, LP), const),                    # Wc (doc half)
            pl.BlockSpec((H, LP), const),                    # Wc (fmap half)
            pl.BlockSpec((1, LP), const),                    # bc
        ],
        out_specs=[
            pl.BlockSpec((TB, LP), lambda b: (b, 0)),        # logits slab
            pl.BlockSpec((TB, S1P), lambda b: (b, 0)),       # attention slab
        ],
    )

    logits_pad, attn_pad = pl.pallas_call(
        _san_kernel,
        out_shape=(
            jax.ShapeDtypeStruct((B_pad, LP), f32),
            jax.ShapeDtypeStruct((B_pad, S1P), f32),
        ),
        grid_spec=grid_spec,
        compiler_params=pltpu.CompilerParams(
            dimension_semantics=("parallel",),
            vmem_limit_bytes=48 * 1024 * 1024,
        ),
    )(emb_bf16, masks, features, normed, wk, wv_t, wm_t, bm, bv,
      wc_doc, wc_fmap, bc)

    return logits_pad[:B, :2], attn_pad[:B, :S1]


def reference_forward(params, embeddings, masks, features):
    """Pure-JAX reference mirroring the PyTorch module exactly (f32)."""
    B, S, E = embeddings.shape
    H = params["wm"].shape[0]
    fmap = features @ params["wm"].T + params["bm"]
    normed = params["trainable"] / jnp.linalg.norm(params["trainable"])
    emb = jnp.concatenate(
        [jnp.broadcast_to(normed[None, :, :], (B, 1, E)), embeddings], axis=1)
    m = jnp.concatenate([jnp.zeros((B, 1), jnp.float32), masks], axis=1)
    keys = emb @ params["wk"].T + params["bk"]
    vals = emb @ params["wv"].T + params["bv"]
    scores = jnp.einsum("bh,bsh->bs", fmap, keys) / math.sqrt(H)
    scores = jnp.where(m != 0.0, -jnp.inf, scores)
    attn = jax.nn.softmax(scores, axis=-1)
    doc = jnp.einsum("bs,bsh->bh", attn, vals)
    logits = jnp.concatenate([doc, fmap], axis=-1) @ params["wc"].T + params["bc"]
    return logits, attn


def init_params(key, embedding_dim, feature_dim, hidden_dim):
    """Deterministic parameter init mirroring the nn.Module's shapes."""
    ks = jax.random.split(key, 9)

    def lin(kw, kb, out_f, in_f):
        bound = 1.0 / math.sqrt(in_f)
        w = jax.random.uniform(kw, (out_f, in_f), jnp.float32, -bound, bound)
        b = jax.random.uniform(kb, (out_f,), jnp.float32, -bound, bound)
        return w, b

    wm, bm = lin(ks[0], ks[1], hidden_dim, feature_dim)       # linear_map
    wk, bk = lin(ks[2], ks[3], hidden_dim, embedding_dim)     # key_layer
    wv, bv = lin(ks[4], ks[5], hidden_dim, embedding_dim)     # value_layer
    wc, bc = lin(ks[6], ks[7], 2, hidden_dim * 2)             # classification
    trainable = jax.random.normal(ks[8], (1, embedding_dim), jnp.float32)
    return {
        "wm": wm, "bm": bm,
        "wk": wk, "bk": bk,
        "wv": wv, "bv": bv,
        "wc": wc, "bc": bc,
        "trainable": trainable,
    }


if __name__ == "__main__":
    # small shapes consistent with the module's forward
    B, S, E, F, H = 2, 8, 64, 28, 32

    key = jax.random.PRNGKey(0)
    k_emb, k_feat, k_params = jax.random.split(key, 3)

    embeddings = jax.random.normal(k_emb, (B, S, E), jnp.float32)
    features = jax.random.normal(k_feat, (B, F), jnp.float32)
    # mark the last two sentences of example 1 as padded
    masks = jnp.zeros((B, S), jnp.float32).at[1, S - 2:].set(1.0)

    params = init_params(k_params, E, F, H)

    logits, attn_weight = sentence_attention_forward(
        params, embeddings, masks, features)
    jax.block_until_ready((logits, attn_weight))

    assert logits.shape == (B, 2)
    assert attn_weight.shape == (B, S + 1)

    # compare against the pure-JAX reference of the module forward
    # (bf16 streaming of embeddings / key / value weights -> ~1e-2 tolerances)
    ref_logits, ref_attn = reference_forward(params, embeddings, masks, features)
    assert bool(jnp.allclose(logits, ref_logits, atol=2e-2, rtol=2e-2))
    assert bool(jnp.allclose(attn_weight, ref_attn, atol=1e-2, rtol=2e-2))

    # padded sentences must receive ~zero attention weight
    assert float(jnp.max(attn_weight[1, -2:])) < 1e-6
    # attention weights sum to 1 over (trainable + sentences)
    assert bool(jnp.allclose(jnp.sum(attn_weight, axis=-1), 1.0, atol=1e-4))

    print("KERNEL_OK")
</pallas_src>

<mosaic_0001>
module attributes {stable_mosaic.version = 11 : i64} {
  func.func @_san_kernel(%arg0: i32, %arg1: memref<8x8x64xbf16, #tpu.memory_space<vmem>>, %arg2: memref<8x8xf32, #tpu.memory_space<vmem>>, %arg3: memref<8x28xf32, #tpu.memory_space<vmem>>, %arg4: memref<1x64xf32, #tpu.memory_space<vmem>>, %arg5: memref<32x64xbf16, #tpu.memory_space<vmem>>, %arg6: memref<64x32xbf16, #tpu.memory_space<vmem>>, %arg7: memref<28x32xf32, #tpu.memory_space<vmem>>, %arg8: memref<1x32xf32, #tpu.memory_space<vmem>>, %arg9: memref<1x32xf32, #tpu.memory_space<vmem>>, %arg10: memref<32x128xf32, #tpu.memory_space<vmem>>, %arg11: memref<32x128xf32, #tpu.memory_space<vmem>>, %arg12: memref<1x128xf32, #tpu.memory_space<vmem>>, %arg13: memref<8x128xf32, #tpu.memory_space<vmem>>, %arg14: memref<8x128xf32, #tpu.memory_space<vmem>>) attributes {dimension_semantics = [#tpu.dimension_semantics<parallel>], iteration_bounds = array<i64: 1>, scalar_prefetch = 0 : i64, scratch_operands = 0 : i64, tpu.core_type = #tpu.core_type<tc>, window_params = [{transform_indices = @transform_0, window_bounds = array<i64: 8, 8, 64>}, {transform_indices = @transform_1, window_bounds = array<i64: 8, 8>}, {transform_indices = @transform_2, window_bounds = array<i64: 8, 28>}, {pipeline_mode = #tpu.pipeline_mode<synchronous>, transform_indices = @transform_3, window_bounds = array<i64: 1, 64>}, {pipeline_mode = #tpu.pipeline_mode<synchronous>, transform_indices = @transform_4, window_bounds = array<i64: 32, 64>}, {pipeline_mode = #tpu.pipeline_mode<synchronous>, transform_indices = @transform_5, window_bounds = array<i64: 64, 32>}, {pipeline_mode = #tpu.pipeline_mode<synchronous>, transform_indices = @transform_6, window_bounds = array<i64: 28, 32>}, {pipeline_mode = #tpu.pipeline_mode<synchronous>, transform_indices = @transform_7, window_bounds = array<i64: 1, 32>}, {pipeline_mode = #tpu.pipeline_mode<synchronous>, transform_indices = @transform_8, window_bounds = array<i64: 1, 32>}, {pipeline_mode = #tpu.pipeline_mode<synchronous>, transform_indices = @transform_9, window_bounds = array<i64: 32, 128>}, {pipeline_mode = #tpu.pipeline_mode<synchronous>, transform_indices = @transform_10, window_bounds = array<i64: 32, 128>}, {pipeline_mode = #tpu.pipeline_mode<synchronous>, transform_indices = @transform_11, window_bounds = array<i64: 1, 128>}, {transform_indices = @transform_12, window_bounds = array<i64: 8, 128>}, {transform_indices = @transform_13, window_bounds = array<i64: 8, 128>}]} {
    %c0 = arith.constant 0 : index
    %c0_0 = arith.constant 0 : index
    %c0_1 = arith.constant 0 : index
    %0 = vector.load %arg1[%c0, %c0_0, %c0_1] : memref<8x8x64xbf16, #tpu.memory_space<vmem>>, vector<8x8x64xbf16>
    %1 = arith.extf %0 : vector<8x8x64xbf16> to vector<8x8x64xf32>
    %c0_2 = arith.constant 0 : index
    %c0_3 = arith.constant 0 : index
    %2 = vector.load %arg2[%c0_2, %c0_3] : memref<8x8xf32, #tpu.memory_space<vmem>>, vector<8x8xf32>
    %c0_4 = arith.constant 0 : index
    %c0_5 = arith.constant 0 : index
    %3 = vector.load %arg3[%c0_4, %c0_5] : memref<8x28xf32, #tpu.memory_space<vmem>>, vector<8x28xf32>
    %c0_6 = arith.constant 0 : index
    %c0_7 = arith.constant 0 : index
    %4 = vector.load %arg7[%c0_6, %c0_7] : memref<28x32xf32, #tpu.memory_space<vmem>>, vector<28x32xf32>
    %cst = arith.constant dense<0.000000e+00> : vector<8x32xf32>
    %5 = tpu.matmul %3, %4, %cst {dimension_numbers = #tpu.dot_dimension_numbers<[1], [0], [0], [1], [0, 0, 1, 1], [], []>} : vector<8x28xf32>, vector<28x32xf32>, vector<8x32xf32> -> vector<8x32xf32>
    %c0_8 = arith.constant 0 : index
    %c0_9 = arith.constant 0 : index
    %6 = vector.load %arg8[%c0_8, %c0_9] : memref<1x32xf32, #tpu.memory_space<vmem>>, vector<1x32xf32>
    %7 = vector.broadcast %6 : vector<1x32xf32> to vector<8x32xf32>
    %8 = arith.addf %5, %7 : vector<8x32xf32>
    %9 = arith.truncf %8 : vector<8x32xf32> to vector<8x32xbf16>
    %c0_10 = arith.constant 0 : index
    %c0_11 = arith.constant 0 : index
    %10 = vector.load %arg5[%c0_10, %c0_11] : memref<32x64xbf16, #tpu.memory_space<vmem>>, vector<32x64xbf16>
    %cst_12 = arith.constant dense<0.000000e+00> : vector<8x64xf32>
    %11 = tpu.matmul %9, %10, %cst_12 {dimension_numbers = #tpu.dot_dimension_numbers<[1], [0], [0], [1], [0, 0, 1, 1], [], []>} : vector<8x32xbf16>, vector<32x64xbf16>, vector<8x64xf32> -> vector<8x64xf32>
    %12 = vector.shape_cast %11 : vector<8x64xf32> to vector<8x1x64xf32>
    %13 = vector.broadcast %12 : vector<8x1x64xf32> to vector<8x8x64xf32>
    %14 = arith.mulf %1, %13 : vector<8x8x64xf32>
    %cst_13 = arith.constant dense<0.000000e+00> : vector<8x8xf32>
    %15 = vector.multi_reduction <add>, %14, %cst_13 [2] : vector<8x8x64xf32> to vector<8x8xf32>
    %cst_14 = arith.constant 0.176776692 : f32
    %16 = vector.broadcast %cst_14 : f32 to vector<8x8xf32>
    %17 = arith.mulf %15, %16 : vector<8x8xf32>
    %cst_15 = arith.constant 0.000000e+00 : f32
    %18 = vector.broadcast %cst_15 : f32 to vector<8x8xf32>
    %19 = arith.cmpf one, %2, %18 : vector<8x8xf32>
    %cst_16 = arith.constant -1.000000e+30 : f32
    %20 = vector.broadcast %cst_16 : f32 to vector<8x8xf32>
    %21 = arith.select %19, %20, %17 : vector<8x8xi1>, vector<8x8xf32>
    %c0_17 = arith.constant 0 : index
    %c0_18 = arith.constant 0 : index
    %22 = vector.load %arg4[%c0_17, %c0_18] : memref<1x64xf32, #tpu.memory_space<vmem>>, vector<1x64xf32>
    %23 = vector.broadcast %22 : vector<1x64xf32> to vector<8x64xf32>
    %24 = arith.mulf %11, %23 : vector<8x64xf32>
    %cst_19 = arith.constant dense<0.000000e+00> : vector<8xf32>
    %25 = vector.multi_reduction <add>, %24, %cst_19 [1] : vector<8x64xf32> to vector<8xf32>
    %26 = vector.shape_cast %25 : vector<8xf32> to vector<8x1xf32>
    %cst_20 = arith.constant 0.176776692 : f32
    %27 = vector.broadcast %cst_20 : f32 to vector<8x1xf32>
    %28 = arith.mulf %26, %27 : vector<8x1xf32>
    %cst_21 = arith.constant dense<0xFF800000> : vector<8xf32>
    %29 = vector.multi_reduction <maximumf>, %21, %cst_21 [1] : vector<8x8xf32> to vector<8xf32>
    %30 = vector.shape_cast %29 : vector<8xf32> to vector<8x1xf32>
    %31 = arith.maximumf %28, %30 : vector<8x1xf32>
    %32 = arith.subf %28, %31 : vector<8x1xf32>
    %33 = math.exp %32 : vector<8x1xf32>
    %34 = vector.broadcast %31 : vector<8x1xf32> to vector<8x8xf32>
    %35 = arith.subf %21, %34 : vector<8x8xf32>
    %36 = math.exp %35 : vector<8x8xf32>
    %cst_22 = arith.constant dense<0.000000e+00> : vector<8xf32>
    %37 = vector.multi_reduction <add>, %36, %cst_22 [1] : vector<8x8xf32> to vector<8xf32>
    %38 = vector.shape_cast %37 : vector<8xf32> to vector<8x1xf32>
    %39 = arith.addf %33, %38 : vector<8x1xf32>
    %cst_23 = arith.constant 1.000000e+00 : f32
    %40 = vector.broadcast %cst_23 : f32 to vector<8x1xf32>
    %41 = arith.divf %40, %39 : vector<8x1xf32>
    %42 = arith.mulf %33, %41 : vector<8x1xf32>
    %43 = vector.broadcast %41 : vector<8x1xf32> to vector<8x8xf32>
    %44 = arith.mulf %36, %43 : vector<8x8xf32>
    %45 = vector.shape_cast %44 : vector<8x8xf32> to vector<8x8x1xf32>
    %46 = vector.broadcast %45 : vector<8x8x1xf32> to vector<8x8x64xf32>
    %47 = arith.mulf %1, %46 : vector<8x8x64xf32>
    %cst_24 = arith.constant dense<0.000000e+00> : vector<8x64xf32>
    %48 = vector.multi_reduction <add>, %47, %cst_24 [1] : vector<8x8x64xf32> to vector<8x64xf32>
    %c0_25 = arith.constant 0 : index
    %c0_26 = arith.constant 0 : index
    %49 = vector.load %arg4[%c0_25, %c0_26] : memref<1x64xf32, #tpu.memory_space<vmem>>, vector<1x64xf32>
    %50 = vector.broadcast %42 : vector<8x1xf32> to vector<8x64xf32>
    %51 = vector.broadcast %49 : vector<1x64xf32> to vector<8x64xf32>
    %52 = arith.mulf %50, %51 : vector<8x64xf32>
    %53 = arith.addf %48, %52 : vector<8x64xf32>
    %54 = arith.truncf %53 : vector<8x64xf32> to vector<8x64xbf16>
    %c0_27 = arith.constant 0 : index
    %c0_28 = arith.constant 0 : index
    %55 = vector.load %arg6[%c0_27, %c0_28] : memref<64x32xbf16, #tpu.memory_space<vmem>>, vector<64x32xbf16>
    %cst_29 = arith.constant dense<0.000000e+00> : vector<8x32xf32>
    %56 = tpu.matmul %54, %55, %cst_29 {dimension_numbers = #tpu.dot_dimension_numbers<[1], [0], [0], [1], [0, 0, 1, 1], [], []>} : vector<8x64xbf16>, vector<64x32xbf16>, vector<8x32xf32> -> vector<8x32xf32>
    %c0_30 = arith.constant 0 : index
    %c0_31 = arith.constant 0 : index
    %57 = vector.load %arg9[%c0_30, %c0_31] : memref<1x32xf32, #tpu.memory_space<vmem>>, vector<1x32xf32>
    %58 = vector.broadcast %57 : vector<1x32xf32> to vector<8x32xf32>
    %59 = arith.addf %56, %58 : vector<8x32xf32>
    %c0_32 = arith.constant 0 : index
    %c0_33 = arith.constant 0 : index
    %60 = vector.load %arg10[%c0_32, %c0_33] : memref<32x128xf32, #tpu.memory_space<vmem>>, vector<32x128xf32>
    %cst_34 = arith.constant dense<0.000000e+00> : vector<8x128xf32>
    %61 = tpu.matmul %59, %60, %cst_34 {dimension_numbers = #tpu.dot_dimension_numbers<[1], [0], [0], [1], [0, 0, 1, 1], [], []>} : vector<8x32xf32>, vector<32x128xf32>, vector<8x128xf32> -> vector<8x128xf32>
    %c0_35 = arith.constant 0 : index
    %c0_36 = arith.constant 0 : index
    %62 = vector.load %arg11[%c0_35, %c0_36] : memref<32x128xf32, #tpu.memory_space<vmem>>, vector<32x128xf32>
    %cst_37 = arith.constant dense<0.000000e+00> : vector<8x128xf32>
    %63 = tpu.matmul %8, %62, %cst_37 {dimension_numbers = #tpu.dot_dimension_numbers<[1], [0], [0], [1], [0, 0, 1, 1], [], []>} : vector<8x32xf32>, vector<32x128xf32>, vector<8x128xf32> -> vector<8x128xf32>
    %64 = arith.addf %61, %63 : vector<8x128xf32>
    %c0_38 = arith.constant 0 : index
    %c0_39 = arith.constant 0 : index
    %65 = vector.load %arg12[%c0_38, %c0_39] : memref<1x128xf32, #tpu.memory_space<vmem>>, vector<1x128xf32>
    %66 = vector.broadcast %65 : vector<1x128xf32> to vector<8x128xf32>
    %67 = arith.addf %64, %66 : vector<8x128xf32>
    %c0_40 = arith.constant 0 : index
    %c0_41 = arith.constant 0 : index
    %68 = vector.load %arg13[%c0_40, %c0_41] : memref<8x128xf32, #tpu.memory_space<vmem>>, vector<8x128xf32>
    tpu.vector_store %arg13[%c0_40, %c0_41], %67 {strides = array<i32>} : memref<8x128xf32, #tpu.memory_space<vmem>>, vector<8x128xf32>,
    %cst_42 = arith.constant 0.000000e+00 : f32
    %69 = vector.broadcast %cst_42 : f32 to vector<8x119xf32>
    %70 = tpu.concatenate %42, %44, %69 in 1 : vector<8x1xf32>, vector<8x8xf32>, vector<8x119xf32> -> vector<8x128xf32>
    %c0_43 = arith.constant 0 : index
    %c0_44 = arith.constant 0 : index
    %71 = vector.load %arg14[%c0_43, %c0_44] : memref<8x128xf32, #tpu.memory_space<vmem>>, vector<8x128xf32>
    tpu.vector_store %arg14[%c0_43, %c0_44], %70 {strides = array<i32>} : memref<8x128xf32, #tpu.memory_space<vmem>>, vector<8x128xf32>,
    return
  }
  func.func @transform_0(%arg0: i32) -> (i32, i32, i32) {
    %c0_i32 = arith.constant 0 : i32
    %c0_i32_0 = arith.constant 0 : i32
    %c0_i32_1 = arith.constant 0 : i32
    return %arg0, %c0_i32, %c0_i32_0 : i32, i32, i32
  }
  func.func @transform_1(%arg0: i32) -> (i32, i32) {
    %c0_i32 = arith.constant 0 : i32
    %c0_i32_0 = arith.constant 0 : i32
    return %arg0, %c0_i32 : i32, i32
  }
  func.func @transform_2(%arg0: i32) -> (i32, i32) {
    %c0_i32 = arith.constant 0 : i32
    %c0_i32_0 = arith.constant 0 : i32
    return %arg0, %c0_i32 : i32, i32
  }
  func.func @transform_3(%arg0: i32) -> (i32, i32) {
    %c0_i32 = arith.constant 0 : i32
    %c0_i32_0 = arith.constant 0 : i32
    %c0_i32_1 = arith.constant 0 : i32
    return %c0_i32, %c0_i32_0 : i32, i32
  }
  func.func @transform_4(%arg0: i32) -> (i32, i32) {
    %c0_i32 = arith.constant 0 : i32
    %c0_i32_0 = arith.constant 0 : i32
    %c0_i32_1 = arith.constant 0 : i32
    return %c0_i32, %c0_i32_0 : i32, i32
  }
  func.func @transform_5(%arg0: i32) -> (i32, i32) {
    %c0_i32 = arith.constant 0 : i32
    %c0_i32_0 = arith.constant 0 : i32
    %c0_i32_1 = arith.constant 0 : i32
    return %c0_i32, %c0_i32_0 : i32, i32
  }
  func.func @transform_6(%arg0: i32) -> (i32, i32) {
    %c0_i32 = arith.constant 0 : i32
    %c0_i32_0 = arith.constant 0 : i32
    %c0_i32_1 = arith.constant 0 : i32
    return %c0_i32, %c0_i32_0 : i32, i32
  }
  func.func @transform_7(%arg0: i32) -> (i32, i32) {
    %c0_i32 = arith.constant 0 : i32
    %c0_i32_0 = arith.constant 0 : i32
    %c0_i32_1 = arith.constant 0 : i32
    return %c0_i32, %c0_i32_0 : i32, i32
  }
  func.func @transform_8(%arg0: i32) -> (i32, i32) {
    %c0_i32 = arith.constant 0 : i32
    %c0_i32_0 = arith.constant 0 : i32
    %c0_i32_1 = arith.constant 0 : i32
    return %c0_i32, %c0_i32_0 : i32, i32
  }
  func.func @transform_9(%arg0: i32) -> (i32, i32) {
    %c0_i32 = arith.constant 0 : i32
    %c0_i32_0 = arith.constant 0 : i32
    %c0_i32_1 = arith.constant 0 : i32
    return %c0_i32, %c0_i32_0 : i32, i32
  }
  func.func @transform_10(%arg0: i32) -> (i32, i32) {
    %c0_i32 = arith.constant 0 : i32
    %c0_i32_0 = arith.constant 0 : i32
    %c0_i32_1 = arith.constant 0 : i32
    return %c0_i32, %c0_i32_0 : i32, i32
  }
  func.func @transform_11(%arg0: i32) -> (i32, i32) {
    %c0_i32 = arith.constant 0 : i32
    %c0_i32_0 = arith.constant 0 : i32
    %c0_i32_1 = arith.constant 0 : i32
    return %c0_i32, %c0_i32_0 : i32, i32
  }
  func.func @transform_12(%arg0: i32) -> (i32, i32) {
    %c0_i32 = arith.constant 0 : i32
    %c0_i32_0 = arith.constant 0 : i32
    return %arg0, %c0_i32 : i32, i32
  }
  func.func @transform_13(%arg0: i32) -> (i32, i32) {
    %c0_i32 = arith.constant 0 : i32
    %c0_i32_0 = arith.constant 0 : i32
    return %arg0, %c0_i32 : i32, i32
  }
}

</mosaic_0001>

<bundles_post_ra>
// kernel: tpu_custom_call.1
= control target key start
LH: loop header
LB: loop body
LE: loop exit
PB: predicated region body
PF: predicated region fallthrough
CT: control target
= control target key end

     0   :  { %19 = vsyncpa [#allocation3], 0  ;;  %s1687_s0 = inlined_call_operand.vmem [shape: bf16[8,8,64], index: 0, kind: input, shape index: {}]   ;;  %s1688_s1 = inlined_call_operand.hbm [shape: f32[8,8], index: 1, kind: input, shape index: {}]   ;;  %s1689_s2 = inlined_call_operand.hbm [shape: f32[8,28], index: 2, kind: input, shape index: {}]   ;;  %s1690_s3 = inlined_call_operand.vmem [shape: f32[1,64], index: 3, kind: input, shape index: {}]   ;;  %s1691_s4 = inlined_call_operand.hbm [shape: bf16[32,64], index: 4, kind: input, shape index: {}]   ;;  %s1692_s5 = inlined_call_operand.vmem [shape: bf16[64,32], index: 5, kind: input, shape index: {}]   ;;  %s1693_s6 = inlined_call_operand.vmem [shape: f32[28,32], index: 6, kind: input, shape index: {}]   ;;  %s1694_s7 = inlined_call_operand.vmem [shape: f32[1,32], index: 7, kind: input, shape index: {}]   ;;  %s1695_s8 = inlined_call_operand.vmem [shape: f32[1,32], index: 8, kind: input, shape index: {}]   ;;  %s1696_s9 = inlined_call_operand.hbm [shape: f32[32,128], index: 9, kind: input, shape index: {}]   ;;  %s1697_s10 = inlined_call_operand.hbm [shape: f32[32,128], index: 10, kind: input, shape index: {}]   ;;  %s1698_s11 = inlined_call_operand.vmem [shape: f32[1,128], index: 11, kind: input, shape index: {}]   ;;  %s1699_s12 = inlined_call_operand.hbm [shape: f32[8,128], index: 12, kind: output, shape index: {0}]   ;;  %s1700_s13 = inlined_call_operand.hbm [shape: f32[8,128], index: 13, kind: output, shape index: {1}]  }
   0x1   :  { %20 = vsyncpa [#allocation6], 0 }
   0x2   :  { %21 = vsyncpa [#allocation9], 0 }
   0x3   :  { %22 = vsyncpa [#allocation4], 0 }
   0x4   :  { %23 = vsyncpa [#allocation13], 0  ;;  %s1291_s25 = smov [#allocation5]   ;;  %s1292_s27 = smov [#allocation8]  }
   0x5   :  { %s42_s26 = sshll.u32 %s1291_s25, 4  ;;  %s73_s28 = sshll.u32 %s1292_s27, 4  ;;  %s43_s26 = int_to_ptr.vmem [resolvable:$true] %s42_s26  ;;  %s1378_s28 = int_to_ptr.vmem [resolvable:$true] %s73_s28 }
   0x6   :  { %s1127_s14 = scalar_lea.hbm %s1689_s2, 128 }
   0x7   :  { %p1128_p0 = scmp.ne.s32.totalorder %s1689_s2, %s1127_s14  ;;  %p1131_p1 = scmp.lt.u32.totalorder %s1127_s14, %s1689_s2 }
   0x9   :  { %p1133_p2 = pnand %p1131_p1, %p1128_p0 }
   0xb   :  { %1136 = shalt.err (!%p1133_p2)
}
   0xc   :  { %s1137_s19 = scalar_lea.vmem %s43_s26, 128  ;;  %p1142_p4 = scmp.lt.s32.totalorder %s43_s26, %s43_s26 }
   0xd   :  { %p1138_p3 = scmp.ne.s32.totalorder %s43_s26, %s1137_s19  ;;  %p1143_p5 = scmp.lt.s32.totalorder %s1137_s19, %s1137_s19 }
   0xf   :  { %p1144_p6 = por %p1143_p5, %p1142_p4 }
  0x11   :  { %p1145_p7 = pnand %p1144_p6, %p1138_p3 }
  0x13   :  { %1148 = shalt.err (!%p1145_p7)
}
  0x14   :  { %45 = dma.hbm_to_vmem [thread:$0]  %s1689_s2, 128, %s43_s26, [#allocation6]  }
  0x15   :  { %s1149_s24 = scalar_lea.hbm %s1696_s9, 512 }
  0x16   :  { %p1150_p8 = scmp.ne.s32.totalorder %s1696_s9, %s1149_s24  ;;  %p1153_p9 = scmp.lt.u32.totalorder %s1149_s24, %s1696_s9 }
  0x18   :  { %p1155_p10 = pnand %p1153_p9, %p1150_p8 }
  0x1a   :  { %1158 = shalt.err (!%p1155_p10)
}
  0x1b   :  { %s1159_s14 = scalar_lea.vmem %s1378_s28, 512  ;;  %p1164_p12 = scmp.lt.s32.totalorder %s1378_s28, %s1378_s28 }
  0x1c   :  { %p1160_p11 = scmp.ne.s32.totalorder %s1378_s28, %s1159_s14  ;;  %p1165_p13 = scmp.lt.s32.totalorder %s1159_s14, %s1159_s14 }
  0x1e   :  { %p1166_p0 = por %p1165_p13, %p1164_p12 }
  0x20   :  { %p1167_p1 = pnand %p1166_p0, %p1160_p11 }
  0x22   :  { %1170 = shalt.err (!%p1167_p1)
}
  0x23   :  { %s1293_s2 = smov 128   ;;  %s1294_s26 = smov 8  }
  0x24   :  { %79 = dma.hbm_to_vmem [thread:$0]  %s1696_s9, 512, %s1378_s28, [#allocation9], %s1293_s2, %s1293_s2, %s1294_s26  }
  0x25   :  { %s1295_s17 = smov [#allocation2]   ;;  %s1296_s19 = smov [#allocation7]  }
  0x26   :  { %s32_s18 = sshll.u32 %s1295_s17, 4  ;;  %s53_s20 = sshll.u32 %s1296_s19, 4  ;;  %s33_s18 = int_to_ptr.vmem [resolvable:$true] %s32_s18  ;;  %s1412_s20 = int_to_ptr.vmem [resolvable:$true] %s53_s20 }
  0x27   :  { %s1171_s23 = scalar_lea.hbm %s1688_s1, 128 }
  0x28   :  { %p1172_p2 = scmp.ne.s32.totalorder %s1688_s1, %s1171_s23  ;;  %p1175_p3 = scmp.lt.u32.totalorder %s1171_s23, %s1688_s1 }
  0x2a   :  { %p1177_p4 = pnand %p1175_p3, %p1172_p2 }
  0x2c   :  { %1180 = shalt.err (!%p1177_p4)
}
  0x2d   :  { %s1181_s9 = scalar_lea.vmem %s33_s18, 128  ;;  %p1186_p6 = scmp.lt.s32.totalorder %s33_s18, %s33_s18 }
  0x2e   :  { %p1182_p5 = scmp.ne.s32.totalorder %s33_s18, %s1181_s9  ;;  %p1187_p7 = scmp.lt.s32.totalorder %s1181_s9, %s1181_s9 }
  0x30   :  { %p1188_p8 = por %p1187_p7, %p1186_p6 }
  0x32   :  { %p1189_p9 = pnand %p1188_p8, %p1182_p5 }
  0x34   :  { %1192 = shalt.err (!%p1189_p9)
}
  0x35   :  { %35 = dma.hbm_to_vmem [thread:$0]  %s1688_s1, 128, %s33_s18, [#allocation3]  }
  0x36   :  { %s1193_s16 = scalar_lea.hbm %s1691_s4, 256 }
  0x37   :  { %p1194_p10 = scmp.ne.s32.totalorder %s1691_s4, %s1193_s16  ;;  %p1197_p11 = scmp.lt.u32.totalorder %s1193_s16, %s1691_s4 }
  0x39   :  { %p1199_p12 = pnand %p1197_p11, %p1194_p10 }
  0x3b   :  { %1202 = shalt.err (!%p1199_p12)
}
  0x3c   :  { %s1203_s23 = scalar_lea.vmem %s1412_s20, 256  ;;  %p1208_p0 = scmp.lt.s32.totalorder %s1412_s20, %s1412_s20 }
  0x3d   :  { %p1204_p13 = scmp.ne.s32.totalorder %s1412_s20, %s1203_s23  ;;  %p1209_p1 = scmp.lt.s32.totalorder %s1203_s23, %s1203_s23 }
  0x3f   :  { %p1210_p2 = por %p1209_p1, %p1208_p0 }
  0x41   :  { %p1211_p3 = pnand %p1210_p2, %p1204_p13 }
  0x43   :  { %1214 = shalt.err (!%p1211_p3)
}
  0x44   :  { %s1297_s1 = smov 64   ;;  %s1298_s18 = smov 4  }
  0x45   :  { %59 = dma.hbm_to_vmem [thread:$0]  %s1691_s4, 256, %s1412_s20, [#allocation6], %s1297_s1, %s1297_s1, %s1298_s18  }
  0x46   :  { %s1299_s27 = smov [#allocation10]   ;;  %s1215_s30 = scalar_lea.hbm %s1697_s10, 512 }
  0x47   :  { %s85_s29 = sshll.u32 %s1299_s27, 4  ;;  %p1216_p4 = scmp.ne.s32.totalorder %s1697_s10, %s1215_s30  ;;  %s86_s29 = int_to_ptr.vmem [resolvable:$true] %s85_s29 }
  0x48   :  { %p1219_p5 = scmp.lt.u32.totalorder %s1215_s30, %s1697_s10 }
  0x4a   :  { %p1221_p6 = pnand %p1219_p5, %p1216_p4 }
  0x4c   :  { %1224 = shalt.err (!%p1221_p6)
}
  0x4d   :  { %s1225_s19 = scalar_lea.vmem %s86_s29, 512  ;;  %p1230_p8 = scmp.lt.s32.totalorder %s86_s29, %s86_s29 }
  0x4e   :  { %p1226_p7 = scmp.ne.s32.totalorder %s86_s29, %s1225_s19  ;;  %p1231_p9 = scmp.lt.s32.totalorder %s1225_s19, %s1225_s19 }
  0x50   :  { %p1232_p10 = por %p1231_p9, %p1230_p8 }
  0x52   :  { %p1233_p11 = pnand %p1232_p10, %p1226_p7 }
  0x54   :  { %1236 = shalt.err (!%p1233_p11)
}
  0x55   :  { %91 = dma.hbm_to_vmem [thread:$0]  %s1697_s10, 512, %s86_s29, [#allocation9], %s1293_s2, %s1293_s2, %s1294_s26  }
  0x56   :  { %1281 = dma.done.wait [#allocation3], 128  }
  0x57   :  { %1282 = vsyncadd [#allocation3], 4294967168 }
  0x58   :  { %1283 = dma.done.wait [#allocation6], 384  }
  0x59   :  { %1284 = vsyncadd [#allocation6], 4294966912 }
  0x5a   :  { %1285 = dma.done.wait [#allocation9], 1024  }
  0x5b   :  { %1286 = vsyncadd [#allocation9], 4294966272  ;;  %v1300_v0 = vmov 0.0|0.0   ;;  %vm1301_vm0 = vmmov 0   ;;  %v1302_v1 = vmov 0.0   ;;  %vm143_vm1 = vcmask 1043456  }
  0x5c   :  { %1079 = vmatprep.subr.bf16.mxu0 %v1300_v0  ;;  %1034 = vmatprep.mubr.msk.f32.mxu0 %vm1301_vm0, %v1302_v1  ;;  %v128_v2 = vld [vmem:[%s1693_s6] sm:$0xff]  ;;  %v129_v3 = vld [vmem:[%s1693_s6 + $0x8] sm:$0xff]  ;;  %v130_v4 = vld [vmem:[%s1693_s6 + $0x10] sm:$0xff]  ;;  %vm1303_vm2 = vmmov 1   ;;  %vm139_vm4 = vcmask 228352   ;;  %vm234_vm5 = vcmask 261120   ;;  %v283_v24 = vlaneseq }
  0x5d   :  { %1037 = vmatprep.subr.bf16.mxu1 %v1302_v1  ;;  %1041 = vmatprep.mubr.msk.bf16.mxu1 %vm1301_vm0, %v1302_v1  ;;  %v1080_v5 = vpack.c.bf16 %v129_v3, %v128_v2  ;;  %v131_v6 = vld [vmem:[%s1693_s6 + $0x18] sm:$0xf]  ;;  %vm1084_vm3 = vmpackc.low %vm143_vm1, %vm1303_vm2  ;;  %v1115_v7 = vld [vmem:[#allocation7] sm:$0xff]   ;;  %v1304_v22 = vmov 1966171168   ;;  %vm376_vm6 = vcmask 523264  }
  0x5e   :  { %v1083_v8 = vpack.c.bf16 %v131_v6, %v130_v4  ;;  %1038 = vmatpush3.bf16.msra.mxu1 %v1115_v7  ;;  %v127_v9 = vld [vmem:[#allocation5] sm:$0xff]  ;;  %v1116_v10 = vld [vmem:[#allocation7 + $0x8] sm:$0xff]   ;;  %v968_v11 = vld [vmem:[%s1694_s7] ss:$0 sm:$0xff]  ;;  %v281_v23 = vunpack.c.l.s4 %v1304_v22  ;;  %v1494_v26 = vshrl.u32 %v283_v24, 7  ;;  %vm452_vm7 = vcmask 1041409  }
  0x5f   :  { %1081 = vmatpush3.bf16.msra.mxu0 %v1080_v5  ;;  %1039 = vmatprep.subr.bf16.mxu1 %v1302_v1  ;;  %v769_v12 = vld [vmem:[#allocation10] sm:$0xff]  ;;  %v770_v13 = vld [vmem:[#allocation10 + $0x8] sm:$0xff]  ;;  %v771_v19 = vld [vmem:[#allocation10 + $0x10] sm:$0xff]  ;;  %vm454_vm8 = vcmask 1042434   ;;  %vm456_vm9 = vcmask 1043459   ;;  %vm458_vm10 = vcmask 1044484  }
  0x60   :  { %1082 = vmatprep.subr.bf16.mxu0 %v1300_v0  ;;  %v1087_v17 = vpack.c.bf16 %v770_v13, %v769_v12  ;;  %v772_v20 = vld [vmem:[#allocation10 + $0x18] sm:$0xff]  ;;  %v282_v25 = vunpack.c.0.s8 %v281_v23  ;;  %v1502_v29 = vld [vmem:[%s1687_s0] sm:$0xff]   ;;  %v1508_v33 = vsub.s32 0, %v1494_v26  ;;  %v1513_v34 = vld [vmem:[%s1687_s0 + $0x8] sm:$0xff]   ;;  %vm460_vm11 = vcmask 1045509   ;;  %s1305_s4 = smov 1  }
  0x61   :  { %v1090_v21 = vpack.c.bf16 %v772_v20, %v771_v19  ;;  %v986_v40 = vunpack.c.l.bf16 %v1502_v29  ;;  %v990_v41 = vunpack.c.l.bf16 %v1513_v34  ;;  %v987_v42 = vunpack.c.h.bf16 %v1502_v29  ;;  %v1522_v47 = vld [vmem:[%s1687_s0 + $0x10] sm:$0xff]   ;;  %v1543_v3 = vld [vmem:[%s1687_s0 + $0x18] sm:$0xff]   ;;  %s1306_s22 = smov [#allocation12]  }
  0x62   :  { %1040 = vmatpush3.bf16.msra.mxu1 %v1116_v10  ;;  %v285_v27 = vsub.s32 %v282_v25, %v1494_v26  ;;  %v991_v48 = vunpack.c.h.bf16 %v1513_v34  ;;  %v994_v55 = vunpack.c.l.bf16 %v1522_v47  ;;  %v995_v2 = vunpack.c.h.bf16 %v1522_v47  ;;  %s953_s23 = sshll.u32 %s1306_s22, 4  ;;  %s954_s23 = int_to_ptr.vmem [resolvable:$true] %s953_s23 }
  0x63   :  { %1085 = vmatpush3.bf16.msk.msra.mxu0 %vm1084_vm3, %v1083_v8  ;;  %1086 = vmatprep.subr.bf16.mxu1 %v1300_v0  ;;  %v998_v10 = vunpack.c.l.bf16 %v1543_v3  ;;  %vm462_vm12 = vcmask 1046534   ;;  %vm464_vm13 = vcmask 1047559   ;;  %vm480_vm15 = vcmask 64512   ;;  %s1237_s1 = scalar_lea.vmem %s954_s23, 128  ;;  %p1242_p13 = scmp.lt.s32.totalorder %s954_s23, %s954_s23 }
  0x64   :  { %1045 = vmatprep.subr.bf16.mxu0 %v1302_v1  ;;  %vm934_vm1 = vcmask 72704   ;;  %p1238_p12 = scmp.ne.s32.totalorder %s954_s23, %s1237_s1  ;;  %p1243_p0 = scmp.lt.s32.totalorder %s1237_s1, %s1237_s1 }
  0x66   :  { %1035 = vmatmul.mubr.msk.f32.vlgmr.msra.gmra.mrb[0].mxu0 %vm139_vm4, %v127_v9  ;;  %p1244_p1 = por %p1243_p0, %p1242_p13 }
  0x67   :  { %1053 = vmatprep.mubr.msk.bf16.mxu0 %vm1301_vm0, %v1302_v1 }
  0x68   :  { %p1245_p2 = pnand %p1244_p1, %p1238_p12 }
 0x139   :  { %v213_v14 = vpop.f32.mrb[0].mxu0 }
 0x13a   :  { %v214_v15 = vadd.f32 %v968_v11, %v213_v14  ;;  %v1036_v16 = vpop.f32.mrb[1].mxu0  ;;  %v999_v14 = vunpack.c.h.bf16 %v1543_v3 }
 0x13c   :  { %v217_v18 = vpack.c.bf16 %v214_v15, %v214_v15 }
 0x13e   :  { %1042 = vmatmul.mubr.msk.bf16.vlgmr.msra.gmra.mrb[0].mxu1 %vm234_vm5, %v217_v18  ;;  %v1565_v18 = vld [vmem:[%s1690_s3] ss:$0 sm:$0xff] }
 0x13f   :  { %1088 = vmatpush3.bf16.msra.mxu1 %v1087_v17  ;;  %1065 = vmatprep.mubr.msk.f32.mxu1 %vm1301_vm0, %v1302_v1 }
 0x140   :  { %1089 = vmatprep.subr.bf16.mxu1 %v1300_v0 }
 0x143   :  { %1091 = vmatpush3.bf16.msra.mxu1 %v1090_v21 }
 0x144   :  { %1092 = vmatprep.subr.bf16.mxu1 %v1300_v0 }
 0x146   :  { %1066 = vmatmul.mubr.msk.f32.vlgmr.msra.gmra.mrb[4].mxu1 %vm234_vm5, %v214_v15 }
 0x147   :  { %1076 = vmatprep.mubr.msk.f32.mxu1 %vm1301_vm0, %v1302_v1  ;;  %vm932_vm0 = vcmask 7168  }
 0x211   :  { %v1497_v28 = vpop.f32.mrb[0].mxu1 }
 0x212   :  { %v279_v30 = vcombine.high %v1497_v28, %v1497_v28  ;;  %v286_v31 = vrot.slane %v1497_v28, %v285_v27  ;;  %v1043_v32 = vpop.f32.mrb[1].mxu1  ;;  %v475_v22 = vmul.f32 %v1565_v18, %v1497_v28 }
 0x213   :  { %v275_v35 = vpop.f32.mrb[2].mxu1 }
 0x214   :  { %v293_v36 = vrot.slane %v279_v30, %v285_v27  ;;  %v294_v37 = vcombine.high %v286_v31, %v286_v31  ;;  %v302_v38 = vrot.slane %v286_v31, %v285_v27  ;;  %v1044_v39 = vpop.f32.mrb[3].mxu1  ;;  %v476_v25 = vsel %vm376_vm6, %v475_v22, 0.0 }
 0x216   :  { %v295_v43 = vcombine.high %v293_v36, %v293_v36  ;;  %v331_v44 = vrot.slane %v302_v38, %v1508_v33  ;;  %v324_v45 = vcombine.high %v302_v38, %v302_v38  ;;  %v316_v46 = vrot.slane %v294_v37, %v285_v27 }
 0x217   :  { %v309_v49 = vrot.slane %v293_v36, %v285_v27 }
 0x218   :  { %v368_v50 = vmul.f32 %v986_v40, %v331_v44  ;;  %v339_v51 = vrot.slane %v324_v45, %v1508_v33  ;;  %v335_v52 = vrot.slane %v316_v46, %v1508_v33  ;;  %v326_v53 = vcombine.high %v316_v46, %v316_v46 }
 0x219   :  { %v1529_v54 = vpop.f32.mrb[4].mxu1  ;;  %v347_v56 = vrot.slane %v309_v49, %v1508_v33  ;;  %v323_v57 = vrot.slane %v295_v43, %v285_v27  ;;  %v325_v58 = vcombine.high %v309_v49, %v309_v49  ;;  %v419_v27 = vand.u32 127, %v283_v24 }
 0x21a   :  { %v1067_v59 = vpop.f32.mrb[5].mxu1  ;;  %v377_v60 = vsel %vm376_vm6, %v368_v50, 0.0  ;;  %v370_v61 = vmul.f32 %v990_v41, %v339_v51  ;;  %v369_v62 = vmul.f32 %v987_v42, %v335_v52  ;;  %v343_v63 = vrot.slane %v326_v53, %v1508_v33 }
 0x21b   :  { %378 = vadd.xlane.f32.xlu0 %v377_v60  ;;  %v351_v6 = vrot.slane %v323_v57, %v1508_v33  ;;  %v327_v7 = vcombine.high %v323_v57, %v323_v57  ;;  %v372_v9 = vmul.f32 %v994_v55, %v347_v56  ;;  %v355_v11 = vrot.slane %v325_v58, %v1508_v33 }
 0x21c   :  { %v383_v4 = vsel %vm376_vm6, %v370_v61, 0.0  ;;  %v371_v5 = vmul.f32 %v991_v48, %v343_v63  ;;  %v380_v8 = vsel %vm376_vm6, %v369_v62, 0.0  ;;  %v422_v32 = vsub.s32 %v419_v27, %v1494_v26  ;;  %v126_v63 = vld [vmem:[#allocation2] sm:$0xff] }
 0x21d   :  { %384 = vadd.xlane.f32.xlu1 %v383_v4  ;;  %v373_v13 = vmul.f32 %v995_v2, %v351_v6  ;;  %v359_v15 = vrot.slane %v327_v7, %v1508_v33  ;;  %v389_v16 = vsel %vm376_vm6, %v372_v9, 0.0  ;;  %v374_v17 = vmul.f32 %v998_v10, %v355_v11 }
 0x21e   :  { %v386_v12 = vsel %vm376_vm6, %v371_v5, 0.0  ;;  %vm409_vm14 = vcmp.ne.f32.partialorder %v126_v63, 0.0 }
 0x21f   :  { %381 = vadd.xlane.f32.xlu0 %v380_v8  ;;  %v392_v19 = vsel %vm376_vm6, %v373_v13, 0.0  ;;  %v375_v20 = vmul.f32 %v999_v14, %v359_v15  ;;  %v395_v21 = vsel %vm376_vm6, %v374_v17, 0.0 }
 0x221   :  { %387 = vadd.xlane.f32.xlu1 %v386_v12  ;;  %v398_v23 = vsel %vm376_vm6, %v375_v20, 0.0 }
 0x223   :  { %390 = vadd.xlane.f32.xlu0 %v389_v16 }
 0x225   :  { %393 = vadd.xlane.f32.xlu1 %v392_v19 }
 0x227   :  { %396 = vadd.xlane.f32.xlu0 %v395_v21 }
 0x229   :  { %399 = vadd.xlane.f32.xlu1 %v398_v23 }
 0x22b   :  { %477 = vadd.xlane.f32.xlu0 %v476_v25 }
 0x2a8   :  { %v379_v30 = vpop.xlane.xlu0 %378 }
 0x2a9   :  { %v401_v35 = vmul.f32 0.17677669, %v379_v30 }
 0x2aa   :  { %v385_v31 = vpop.xlane.xlu1 %384 }
 0x2ab   :  { %v403_v36 = vmul.f32 0.17677669, %v385_v31  ;;  %v423_v28 = vrot.slane %v401_v35, %v422_v32  ;;  %v508_v35 = vsub.s32 1, %v1494_v26 }
 0x2ac   :  { %v382_v37 = vpop.xlane.xlu0 %381 }
 0x2ad   :  { %v402_v38 = vmul.f32 0.17677669, %v382_v37  ;;  %v431_v45 = vrot.slane %v403_v36, %v422_v32 }
 0x2ae   :  { %v388_v39 = vpop.xlane.xlu1 %387 }
 0x2af   :  { %v427_v43 = vrot.slane %v402_v38, %v422_v32  ;;  %v404_v44 = vmul.f32 0.17677669, %v388_v39 }
 0x2b0   :  { %v391_v46 = vpop.xlane.xlu0 %390 }
 0x2b1   :  { %v453_v49 = vsel %vm452_vm7, %v427_v43, %v423_v28  ;;  %v435_v24 = vrot.slane %v404_v44, %v422_v32  ;;  %v405_v50 = vmul.f32 0.17677669, %v391_v46  ;;  %v536_v43 = vsub.s32 5, %v1494_v26 }
 0x2b2   :  { %v455_v51 = vsel %vm454_vm8, %v431_v45, %v453_v49  ;;  %v394_v52 = vpop.xlane.xlu1 %393  ;;  %v550_v46 = vsub.s32 7, %v1494_v26  ;;  %v522_v49 = vsub.s32 3, %v1494_v26 }
 0x2b3   :  { %v457_v53 = vsel %vm456_vm9, %v435_v24, %v455_v51  ;;  %v439_v56 = vrot.slane %v405_v50, %v422_v32  ;;  %v406_v57 = vmul.f32 0.17677669, %v394_v52  ;;  %v529_v51 = vsub.s32 4, %v1494_v26 }
 0x2b4   :  { %v397_v58 = vpop.xlane.xlu0 %396 }
 0x2b5   :  { %v459_v59 = vsel %vm458_vm10, %v439_v56, %v457_v53  ;;  %v443_v60 = vrot.slane %v406_v57, %v422_v32  ;;  %v407_v61 = vmul.f32 0.17677669, %v397_v58  ;;  %v543_v53 = vsub.s32 6, %v1494_v26  ;;  %v1118_v57 = vld [vmem:[%s1692_s5 + $0x8] sm:$0xff]   ;;  %v1120_v58 = vld [vmem:[%s1692_s5 + $0x18] sm:$0xff]  }
 0x2b6   :  { %v400_v62 = vpop.xlane.xlu1 %399 }
 0x2b7   :  { %v447_v4 = vrot.slane %v407_v61, %v422_v32  ;;  %v408_v5 = vmul.f32 0.17677669, %v400_v62  ;;  %v461_v6 = vsel %vm460_vm11, %v443_v60, %v459_v59  ;;  %v765_v59 = vld [vmem:[#allocation8] sm:$0xff]  ;;  %v766_v60 = vld [vmem:[#allocation8 + $0x8] sm:$0xff] }
 0x2b8   :  { %v478_v13 = vpop.xlane.xlu0 %477  ;;  %v1093_v61 = vpack.c.bf16 %v766_v60, %v765_v59 }
 0x2b9   :  { %v451_v7 = vrot.slane %v408_v5, %v422_v32  ;;  %v463_v8 = vsel %vm462_vm12, %v447_v4, %v461_v6  ;;  %v479_v15 = vmul.f32 0.17677669, %v478_v13  ;;  %v515_v32 = vsub.s32 2, %v1494_v26  ;;  %v1119_v26 = vld [vmem:[%s1692_s5 + $0x10] sm:$0xff]  }
 0x2ba   :  { %1094 = vmatpush3.bf16.msra.mxu1 %v1093_v61 }
 0x2bb   :  { %v465_v9 = vsel %vm464_vm13, %v451_v7, %v463_v8  ;;  %1095 = vmatprep.subr.bf16.mxu1 %v1300_v0 }
 0x2bc   :  { %v467_v11 = vsel %vm409_vm14, -1e+30, %v465_v9 }
 0x2bd   :  { %v481_v12 = vsel %vm480_vm15, %v467_v11, -inf }
 0x2be   :  { %482 = vmax.xlane.f32.xlu1 %v481_v12 }
 0x34b   :  { %v483_v16 = vpop.xlane.xlu1 %482 }
 0x34c   :  { %v484_v17 = vmax.f32 %v479_v15, %v483_v16 }
 0x34e   :  { %v485_v19 = vsub.f32 %v479_v15, %v484_v17  ;;  %v488_v20 = vsub.f32 %v467_v11, %v484_v17 }
 0x350   :  { %v489_v21 = vmul.f32 1.442695, %v488_v20  ;;  %v486_v25 = vmul.f32 1.442695, %v485_v19 }
 0x352   :  { %1121 = vpow2.f32 %v489_v21 }
 0x353   :  { %1123 = vpow2.f32 %v486_v25 }
 0x35c   :  { %v1122_v22 = vpop.eup %1121 }
 0x35d   :  { %v491_v23 = vsel %vm480_vm15, %v1122_v22, 0.0  ;;  %v1124_v27 = vpop.eup %1123 }
 0x35e   :  { %492 = vadd.xlane.f32.xlu0 %v491_v23 }
 0x3eb   :  { %v493_v30 = vpop.xlane.xlu0 %492 }
 0x3ec   :  { %v494_v31 = vadd.f32 %v1124_v27, %v493_v30 }
 0x3ee   :  { %1125 = vrcp.f32 %v494_v31 }
 0x3f8   :  { %v1126_v36 = vpop.eup %1125 }
 0x3f9   :  { %v498_v37 = vmul.f32 %v1126_v36, %v1122_v22  ;;  %v1586_v38 = vmul.f32 %v1126_v36, %v1124_v27 }
 0x3fb   :  { %v516_v39 = vrot.slane %v498_v37, %v515_v32  ;;  %v509_v28 = vrot.slane %v498_v37, %v508_v35  ;;  %v537_v44 = vrot.slane %v498_v37, %v536_v43  ;;  %v502_v45 = vrot.slane %v498_v37, %v1508_v33  ;;  %v1117_v33 = vld [vmem:[%s1692_s5] sm:$0xff]  }
 0x3fc   :  { %v551_v24 = vrot.slane %v498_v37, %v550_v46  ;;  %v523_v50 = vrot.slane %v498_v37, %v522_v49  ;;  %v530_v52 = vrot.slane %v498_v37, %v529_v51  ;;  %v544_v56 = vrot.slane %v498_v37, %v543_v53  ;;  %1046 = vmatpush3.bf16.msra.mxu0 %v1117_v33 }
 0x3fd   :  { %518 = vbcast.lane.b32.xlu0 %v516_v39, 256  ;;  %511 = vbcast.lane.b32.xlu1 %v509_v28, 256  ;;  %v1630_v32 = vmul.f32 %v1565_v18, %v1586_v38 }
 0x3fe   :  { %1047 = vmatprep.subr.bf16.mxu0 %v1302_v1 }
 0x3ff   :  { %v621_v18 = vrot.slane %v1630_v32, 1  ;;  %v622_v59 = vrot.slane %v1630_v32, 2  ;;  %v623_v60 = vrot.slane %v1630_v32, 3 }
 0x400   :  { %1048 = vmatpush3.bf16.msra.mxu0 %v1118_v57 }
 0x401   :  { %539 = vbcast.lane.b32.xlu0 %v537_v44, 256  ;;  %504 = vbcast.lane.b32.xlu1 %v502_v45, 256 }
 0x402   :  { %1049 = vmatprep.subr.bf16.mxu0 %v1302_v1 }
 0x404   :  { %1050 = vmatpush3.bf16.msra.mxu0 %v1119_v26 }
 0x405   :  { %553 = vbcast.lane.b32.xlu0 %v551_v24, 256  ;;  %525 = vbcast.lane.b32.xlu1 %v523_v50, 256 }
 0x406   :  { %1051 = vmatprep.subr.bf16.mxu0 %v1302_v1 }
 0x408   :  { %1052 = vmatpush3.bf16.msra.mxu0 %v1120_v58 }
 0x409   :  { %532 = vbcast.lane.b32.xlu1 %v530_v52, 256 }
 0x40d   :  { %546 = vbcast.lane.b32.xlu1 %v544_v56, 256 }
 0x411   :  { %929 = vrot.lane.b32.xlu1 %v498_v37, %s1305_s4 }
 0x46f   :  { %v519_v62 = vpop.permute.xlu0 %518  ;;  %v512_v63 = vpop.permute.xlu1 %511 }
 0x470   :  { %v557_v4 = vmul.f32 %v990_v41, %v519_v62  ;;  %v556_v5 = vmul.f32 %v987_v42, %v512_v63 }
 0x472   :  { %v577_v6 = vsel %vm376_vm6, %v557_v4, 0.0  ;;  %v570_v7 = vsel %vm376_vm6, %v556_v5, 0.0 }
 0x473   :  { %v578_v1 = vrot.slane %v577_v6, 4  ;;  %v571_v8 = vrot.slane %v570_v7, 4  ;;  %v540_v9 = vpop.permute.xlu0 %539  ;;  %v505_v11 = vpop.permute.xlu1 %504 }
 0x474   :  { %v560_v12 = vmul.f32 %v995_v2, %v540_v9  ;;  %v555_v0 = vmul.f32 %v986_v40, %v505_v11 }
 0x475   :  { %v579_v13 = vadd.f32 %v578_v1, %v577_v6  ;;  %v572_v15 = vadd.f32 %v571_v8, %v570_v7 }
 0x476   :  { %v598_v41 = vsel %vm376_vm6, %v560_v12, 0.0  ;;  %v563_v42 = vsel %vm376_vm6, %v555_v0, 0.0 }
 0x477   :  { %v580_v16 = vrot.slane %v579_v13, 2  ;;  %v573_v17 = vrot.slane %v572_v15, 2  ;;  %v599_v19 = vrot.slane %v598_v41, 4  ;;  %v564_v20 = vrot.slane %v563_v42, 4  ;;  %v554_v21 = vpop.permute.xlu0 %553  ;;  %v526_v22 = vpop.permute.xlu1 %525 }
 0x478   :  { %v562_v23 = vmul.f32 %v999_v14, %v554_v21  ;;  %v558_v2 = vmul.f32 %v991_v48, %v526_v22 }
 0x479   :  { %v581_v29 = vadd.f32 %v580_v16, %v579_v13  ;;  %v574_v40 = vadd.f32 %v573_v17, %v572_v15  ;;  %v600_v25 = vadd.f32 %v599_v19, %v598_v41  ;;  %v565_v27 = vadd.f32 %v564_v20, %v563_v42 }
 0x47a   :  { %v612_v30 = vsel %vm376_vm6, %v562_v23, 0.0  ;;  %v584_v31 = vsel %vm376_vm6, %v558_v2, 0.0  ;;  %v625_v41 = vrot.slane %v1630_v32, 5  ;;  %v627_v19 = vrot.slane %v1630_v32, 7 }
 0x47b   :  { %v582_v35 = vrot.slane %v581_v29, 1  ;;  %v575_v36 = vrot.slane %v574_v40, 1  ;;  %v601_v37 = vrot.slane %v600_v25, 2  ;;  %v566_v39 = vrot.slane %v565_v27, 2  ;;  %v533_v14 = vpop.permute.xlu1 %532 }
 0x47c   :  { %v613_v28 = vrot.slane %v612_v30, 4  ;;  %v585_v34 = vrot.slane %v584_v31, 4  ;;  %v559_v48 = vmul.f32 %v994_v55, %v533_v14 }
 0x47d   :  { %v576_v43 = vadd.f32 %v575_v36, %v574_v40  ;;  %v602_v44 = vadd.f32 %v601_v37, %v600_v25  ;;  %v567_v45 = vadd.f32 %v566_v39, %v565_v27  ;;  %v583_v50 = vadd.f32 %v582_v35, %v581_v29 }
 0x47e   :  { %v614_v46 = vadd.f32 %v613_v28, %v612_v30  ;;  %v586_v49 = vadd.f32 %v585_v34, %v584_v31  ;;  %v591_v24 = vsel %vm376_vm6, %v559_v48, 0.0  ;;  %v624_v25 = vrot.slane %v1630_v32, 4 }
 0x47f   :  { %v603_v51 = vrot.slane %v602_v44, 1  ;;  %v568_v52 = vrot.slane %v567_v45, 1  ;;  %v592_v53 = vrot.slane %v591_v24, 4  ;;  %v547_v56 = vpop.permute.xlu1 %546  ;;  %v637_v55 = vadd.f32 %v621_v18, %v576_v43 }
 0x480   :  { %v615_v33 = vrot.slane %v614_v46, 2  ;;  %v587_v57 = vrot.slane %v586_v49, 2  ;;  %v561_v47 = vmul.f32 %v998_v10, %v547_v56  ;;  %v638_v1 = vadd.f32 %v622_v59, %v583_v50 }
 0x481   :  { %v569_v26 = vadd.f32 %v568_v52, %v567_v45  ;;  %v593_v58 = vadd.f32 %v592_v53, %v591_v24  ;;  %v604_v3 = vadd.f32 %v603_v51, %v602_v44  ;;  %v645_v9 = vpack.c.bf16 %v637_v55, %v637_v55 }
 0x482   :  { %v616_v61 = vadd.f32 %v615_v33, %v614_v46  ;;  %v588_v62 = vadd.f32 %v587_v57, %v586_v49  ;;  %v605_v63 = vsel %vm376_vm6, %v561_v47, 0.0  ;;  %v646_v20 = vpack.c.bf16 %v638_v1, %v638_v1 }
 0x483   :  { %v594_v4 = vrot.slane %v593_v58, 2  ;;  %v606_v5 = vrot.slane %v605_v63, 4  ;;  %v930_v6 = vpop.permute.xlu1 %929  ;;  %v636_v7 = vadd.f32 %v1630_v32, %v569_v26  ;;  %v641_v22 = vadd.f32 %v625_v41, %v604_v3 }
 0x484   :  { %v617_v10 = vrot.slane %v616_v61, 1  ;;  %v589_v8 = vrot.slane %v588_v62, 1  ;;  %v933_v0 = vsel %vm932_vm0, %v1586_v38, %v930_v6  ;;  %v676_v23 = vunpack.c.l.b16 %v645_v9 }
 0x485   :  { %v595_v11 = vadd.f32 %v594_v4, %v593_v58  ;;  %v607_v12 = vadd.f32 %v606_v5, %v605_v63  ;;  %v644_v42 = vpack.c.bf16 %v636_v7, %v636_v7  ;;  %v935_v2 = vsel %vm934_vm1, %v933_v0, 0.0  ;;  %v975_v4 = vld [vmem:[%s1695_s8] ss:$0 sm:$0xff] }
 0x486   :  { %v618_v13 = vadd.f32 %v617_v10, %v616_v61  ;;  %v590_v15 = vadd.f32 %v589_v8, %v588_v62  ;;  %936 = vst [vmem:[#allocation12] sm:$0xff] %v935_v2  ;;  %v677_v36 = vunpack.c.l.b16 %v646_v20  ;;  %v649_v37 = vpack.c.bf16 %v641_v22, %v641_v22  ;;  %v767_v61 = vld [vmem:[#allocation8 + $0x10] sm:$0xff]  ;;  %v768_v62 = vld [vmem:[#allocation8 + $0x18] sm:$0xff] }
 0x487   :  { %v596_v16 = vrot.slane %v595_v11, 1  ;;  %v608_v17 = vrot.slane %v607_v12, 2  ;;  %v675_v30 = vunpack.c.l.b16 %v644_v42  ;;  %v683_v14 = vrot.slane %v676_v23, 7 }
 0x488   :  { %v639_v21 = vadd.f32 %v623_v60, %v590_v15  ;;  %v643_v38 = vadd.f32 %v627_v19, %v618_v13  ;;  %v626_v34 = vrot.slane %v1630_v32, 6  ;;  %v685_v24 = vrot.slane %v677_v36, 6 }
 0x489   :  { %v597_v29 = vadd.f32 %v596_v16, %v595_v11  ;;  %v609_v40 = vadd.f32 %v608_v17, %v607_v12  ;;  %v684_v44 = vsel %vm452_vm7, %v683_v14, %v675_v30  ;;  %v680_v18 = vunpack.c.l.b16 %v649_v37 }
 0x48a   :  { %v647_v27 = vpack.c.bf16 %v639_v21, %v639_v21  ;;  %v651_v43 = vpack.c.bf16 %v643_v38, %v643_v38  ;;  %v686_v51 = vsel %vm454_vm8, %v685_v24, %v684_v44  ;;  %v1096_v63 = vpack.c.bf16 %v768_v62, %v767_v61 }
 0x48b   :  { %v610_v31 = vrot.slane %v609_v40, 1  ;;  %v640_v35 = vadd.f32 %v624_v25, %v597_v29  ;;  %v691_v32 = vrot.slane %v680_v18, 3 }
 0x48c   :  { %v678_v39 = vunpack.c.l.b16 %v647_v27  ;;  %v682_v53 = vunpack.c.l.b16 %v651_v43  ;;  %1097 = vmatpush3.bf16.msra.mxu1 %v1096_v63 }
 0x48d   :  { %v611_v28 = vadd.f32 %v610_v31, %v609_v40  ;;  %v648_v48 = vpack.c.bf16 %v640_v35, %v640_v35 }
 0x48e   :  { %v687_v45 = vrot.slane %v678_v39, 5  ;;  %v695_v26 = vrot.slane %v682_v53, 1 }
 0x48f   :  { %v642_v46 = vadd.f32 %v626_v34, %v611_v28  ;;  %v679_v49 = vunpack.c.l.b16 %v648_v48 }
 0x490   :  { %v688_v56 = vsel %vm456_vm9, %v687_v45, %v686_v51 }
 0x491   :  { %v650_v50 = vpack.c.bf16 %v642_v46, %v642_v46  ;;  %v689_v52 = vrot.slane %v679_v49, 4 }
 0x493   :  { %v681_v33 = vunpack.c.l.b16 %v650_v50  ;;  %v690_v57 = vsel %vm458_vm10, %v689_v52, %v688_v56 }
 0x494   :  { %v692_v55 = vsel %vm460_vm11, %v691_v32, %v690_v57 }
 0x495   :  { %v693_v47 = vrot.slane %v681_v33, 2 }
 0x497   :  { %v694_v58 = vsel %vm462_vm12, %v693_v47, %v692_v55 }
 0x498   :  { %v696_v59 = vsel %vm464_vm13, %v695_v26, %v694_v58 }
 0x499   :  { %v697_v60 = vpack.c.b16 %v696_v59, %v696_v59 }
 0x49b   :  { %1054 = vmatmul.mubr.msk.bf16.vlgmr.msra.gmra.mrb[4].mxu0 %vm376_vm6, %v697_v60 }
 0x56e   :  { %v759_v5 = vpop.f32.mrb[4].mxu0 }
 0x56f   :  { %v760_v6 = vadd.f32 %v975_v4, %v759_v5  ;;  %v1055_v7 = vpop.f32.mrb[5].mxu0 }
 0x570   :  { %v762_v1 = vpop.f32.mrb[6].mxu0 }
 0x571   :  { %v1056_v3 = vpop.f32.mrb[7].mxu0  ;;  %1077 = vmatmul.mubr.msk.f32.vlgmr.msra.gmra.mrb[6].mxu1 %vm234_vm5, %v760_v6 }
 0x572   :  { %1248 = shalt.err (!%p1245_p2)
}
 0x573   :  { %s1249_s8 = scalar_lea.hbm %s1700_s13, 128 }
 0x574   :  { %p1250_p3 = scmp.ne.s32.totalorder %s1700_s13, %s1249_s8  ;;  %p1253_p4 = scmp.lt.u32.totalorder %s1249_s8, %s1700_s13 }
 0x576   :  { %p1255_p5 = pnand %p1253_p4, %p1250_p3 }
 0x578   :  { %1258 = shalt.err (!%p1255_p5)
}
 0x579   :  { %956 = dma.vmem_to_hbm [thread:$0]  %s954_s23, 128, %s1700_s13, [#allocation13]   ;;  %v983_v8 = vld [vmem:[%s1698_s11] ss:$0 sm:$0xff] }
 0x57a   :  { %s1307_s14 = smov [#allocation11]  }
 0x57b   :  { %s943_s0 = sshll.u32 %s1307_s14, 4  ;;  %s944_s0 = int_to_ptr.vmem [resolvable:$true] %s943_s0 }
 0x57c   :  { %s1259_s15 = scalar_lea.vmem %s944_s0, 128  ;;  %p1264_p7 = scmp.lt.s32.totalorder %s944_s0, %s944_s0 }
 0x57d   :  { %p1260_p6 = scmp.ne.s32.totalorder %s944_s0, %s1259_s15  ;;  %p1265_p8 = scmp.lt.s32.totalorder %s1259_s15, %s1259_s15 }
 0x57f   :  { %p1266_p9 = por %p1265_p8, %p1264_p7 }
 0x581   :  { %p1267_p10 = pnand %p1266_p9, %p1260_p6 }
 0x644   :  { %v915_v10 = vpop.f32.mrb[6].mxu1 }
 0x645   :  { %v916_v9 = vadd.f32 %v915_v10, %v1529_v54  ;;  %v1078_v11 = vpop.f32.mrb[7].mxu1 }
 0x647   :  { %v926_v12 = vadd.f32 %v983_v8, %v916_v9 }
 0x649   :  { %927 = vst [vmem:[#allocation11] sm:$0xff] %v926_v12 }
 0x64a   :  { %1270 = shalt.err (!%p1267_p10)
}
 0x64b   :  { %s1271_s16 = scalar_lea.hbm %s1699_s12, 128 }
 0x64c   :  { %p1272_p11 = scmp.ne.s32.totalorder %s1699_s12, %s1271_s16  ;;  %p1275_p12 = scmp.lt.u32.totalorder %s1271_s16, %s1699_s12 }
 0x64e   :  { %p1277_p13 = pnand %p1275_p12, %p1272_p11 }
 0x650   :  { %1280 = shalt.err (!%p1277_p13)
}
 0x651   :  { %946 = dma.vmem_to_hbm [thread:$0]  %s944_s0, 128, %s1699_s12, [#allocation4]  }
 0x652   :  { %1287 = dma.done.wait [#allocation4], 128  }
 0x653   :  { %1288 = vsyncadd [#allocation4], 4294967168 }
 0x654   :  { %1289 = dma.done.wait [#allocation13], 128  }
 0x655   :  { %1290 = vsyncadd [#allocation13], 4294967168 }
 0x656   :  { %963 = vsyncpa [#allocation3], 1 }
 0x657   :  { %964 = vsyncpa [#allocation6], 1 }
 0x658   :  { %965 = vsyncpa [#allocation9], 1 }
 0x659   :  { %966 = vsyncpa [#allocation4], 1 }
 0x65a   :  { %967 = vsyncpa [#allocation13], 1 }

</bundles_post_ra>
